<compile_context>
chip_gen: v7x
topology: tpu7x:2x2x1
jax: 0.10.0
libtpu: 0.0.40
codegen_flags: <defaults>
</compile_context>

<pallas_src>
import functools

import jax
import jax.numpy as jnp
from jax.experimental import pallas as pl
from jax.experimental.pallas import tpu as pltpu


# ------------------------------ planning helpers ---------------------------- #

def _round_up(a, b):
    return (a + b - 1) // b * b


def _vmem_capacity_bytes():
    try:
        return int(pltpu.get_tpu_info().vmem_capacity_bytes)
    except Exception:
        return 64 << 20          # conservative (v7x-sized) fallback


def _plan_rows(R, row_bytes, budget_bytes, g):
    """Row tiling for a (R, HW) pass.

    Returns (tile_rows, padded_rows): tile_rows is a multiple of `g`, divides
    padded_rows, keeps the tile under `budget_bytes` and leaves >= 2 grid
    steps whenever possible (DMA pipelining + v7x megacore).
    """
    limit = max(g, (budget_bytes // max(row_bytes, 1)) // g * g)
    Rg = _round_up(R, g)
    if Rg >= 2 * g:
        limit = min(limit, max(g, (Rg // 2) // g * g))
    limit = max(g, min(limit, Rg))
    # Prefer a tile that divides Rg (minimal padding).
    best = g
    t = g
    while t <= limit:
        if Rg % t == 0:
            best = t
        t += g
    if best * 4 >= limit:
        return best, Rg
    # Awkward factorization: pad rows so a near-budget tile divides evenly
    # (graceful degradation instead of tiny tiles or one giant block).
    return limit, _round_up(R, limit)


def _plan_pass1_rows(R_pad, tr2, row_bytes, budget_bytes):
    """Pass-1 tile = m * tr2 with m a divisor of R_pad//tr2, within budget,
    keeping >= 2 grid steps when possible (pass 1 has only one wide operand,
    so it can take ~2x larger tiles than pass 2 for the same VMEM peak)."""
    n2 = R_pad // tr2
    m_budget = max(1, budget_bytes // max(tr2 * row_bytes, 1))
    m_cap = max(1, n2 // 2) if n2 >= 2 else 1
    m = 1
    for cand in range(1, min(m_budget, m_cap, n2) + 1):
        if n2 % cand == 0:
            m = cand
    return tr2 * m


# ------------------------------ kernels ------------------------------------- #

def _bn_fused_kernel(x_ref, gamma_ref, beta_ref, o_ref, *, eps, inv_count):
    # x_ref/o_ref: (N, C, HW), fully VMEM-resident; gamma/beta: (1, C, 1).
    # Exact two-pass mean/var (numerically stable), single HBM read of x.
    x = x_ref[...].astype(jnp.float32)
    mean = jnp.sum(jnp.sum(x, axis=2, keepdims=True), axis=0, keepdims=True)
    mean = mean * inv_count
    d = x - mean
    var = jnp.sum(jnp.sum(d * d, axis=2, keepdims=True), axis=0, keepdims=True)
    var = var * inv_count
    scale = gamma_ref[...] * jax.lax.rsqrt(var + eps)
    shift = beta_ref[...] - mean * scale
    o_ref[...] = (x * scale + shift).astype(o_ref.dtype)


def _bn_stats_kernel(x_ref, sum_ref, sumsq_ref, piv_ref):
    # x_ref: (TR, HW) tile.  Shifted accumulation (pivot = the row's first
    # element) avoids E[x^2]-mean^2 catastrophic cancellation in f32.
    x = x_ref[...].astype(jnp.float32)
    piv = x[:, 0:1]
    xs = x - piv
    sum_ref[...] = jnp.sum(xs, axis=1, keepdims=True)
    sumsq_ref[...] = jnp.sum(xs * xs, axis=1, keepdims=True)
    piv_ref[...] = piv


def _bn_norm_kernel(x_ref, scale_ref, shift_ref, o_ref, *, tr):
    # x_ref/o_ref: (TR, HW) tile; scale/shift: (R_pad, 1), VMEM-resident across
    # the whole grid -> sliced per tile here instead of re-DMA'd each step.
    r0 = pl.multiple_of(pl.program_id(0) * tr, 8)
    sc = scale_ref[pl.ds(r0, tr), :]
    sh = shift_ref[pl.ds(r0, tr), :]
    o_ref[...] = (x_ref[...].astype(jnp.float32) * sc + sh).astype(o_ref.dtype)


# ------------------------------ wrapper ------------------------------------- #

def batchnorm2d_pallas(x_nchw, gamma, beta, eps=1e-5, *,
                       force_tiled=False, donate_x=False):
    """Training-mode BatchNorm2d (per-channel stats over N,H,W) on NCHW input."""
    N, C, H, W = x_nchw.shape
    HW = H * W
    R = N * C
    dtype = x_nchw.dtype
    itemsize = jnp.dtype(dtype).itemsize
    x_bytes = R * HW * itemsize
    f32_bytes = R * HW * 4

    vmem_cap = _vmem_capacity_bytes()
    vmem_budget = int(vmem_cap * 0.70)       # scoped-VMEM limit we request

    gamma32 = gamma.astype(jnp.float32)
    beta32 = beta.astype(jnp.float32)
    io_alias = {0: 0} if donate_x else {}

    # ---------------- fused fast path: whole tensor resident in VMEM ---------
    fused_need = 2 * x_bytes + 2 * f32_bytes + (1 << 20)
    if (not force_tiled) and fused_need <= int(0.8 * vmem_budget):
        x_3d = x_nchw.reshape(N, C, HW)
        out_3d = pl.pallas_call(
            functools.partial(_bn_fused_kernel, eps=float(eps),
                              inv_count=1.0 / float(N * HW)),
            out_shape=jax.ShapeDtypeStruct((N, C, HW), dtype),
            input_output_aliases=io_alias,
            compiler_params=pltpu.CompilerParams(vmem_limit_bytes=vmem_budget),
            cost_estimate=pl.CostEstimate(
                flops=5 * R * HW, transcendentals=C,
                bytes_accessed=2 * x_bytes),
        )(x_3d, gamma32.reshape(1, C, 1), beta32.reshape(1, C, 1))
        return out_3d.reshape(N, C, H, W)

    # ---------------- tiled two-pass path -------------------------------------
    # TODO(synk): when H*W is not a multiple of 128 (e.g. 7x7 feature maps) the
    # lane dimension is partially masked; a lane-dense regrouping/padding would
    # recover full store bandwidth but is not done here.
    x_2d = x_nchw.reshape(R, HW)             # zero-copy view, H*W on lanes
    row_bytes = HW * itemsize
    g = max(8, 32 // itemsize)               # dtype-aware sublane granularity

    tile2_budget = vmem_budget // 8          # pass 2: ~4x tile (in+out, dbl-buffered)
    tile1_budget = vmem_budget // 4          # pass 1: ~2x tile (input only)

    tr2, R_pad = _plan_rows(R, row_bytes, tile2_budget, g)
    tr1 = _plan_pass1_rows(R_pad, tr2, row_bytes, tile1_budget)

    x_rows = x_2d if R_pad == R else jnp.pad(x_2d, ((0, R_pad - R), (0, 0)))

    # ---- pass 1: per-row shifted sums / sums of squares (f32) ----
    row_sum, row_sumsq, row_piv = pl.pallas_call(
        _bn_stats_kernel,
        out_shape=(jax.ShapeDtypeStruct((R_pad, 1), jnp.float32),
                   jax.ShapeDtypeStruct((R_pad, 1), jnp.float32),
                   jax.ShapeDtypeStruct((R_pad, 1), jnp.float32)),
        grid=(R_pad // tr1,),
        in_specs=[pl.BlockSpec((tr1, HW), lambda i: (i, 0))],
        out_specs=(pl.BlockSpec((tr1, 1), lambda i: (i, 0)),
                   pl.BlockSpec((tr1, 1), lambda i: (i, 0)),
                   pl.BlockSpec((tr1, 1), lambda i: (i, 0))),
        compiler_params=pltpu.CompilerParams(
            dimension_semantics=("parallel",),
            vmem_limit_bytes=vmem_budget),
        cost_estimate=pl.CostEstimate(
            flops=4 * R_pad * HW, transcendentals=0,
            bytes_accessed=R_pad * HW * itemsize + 3 * R_pad * 4),
    )(x_rows)

    # ---- tiny per-channel combine (plain JAX, O(N*C) data) ----
    count = float(N * HW)
    hw_f = float(HW)
    s = row_sum[:R].reshape(N, C)            # sum_j (x - p_r)
    ss = row_sumsq[:R].reshape(N, C)         # sum_j (x - p_r)^2
    p = row_piv[:R].reshape(N, C)
    mean = jnp.sum(s + hw_f * p, axis=0) / count                    # (C,)
    d = p - mean[None, :]
    var = jnp.maximum(
        jnp.sum(ss + 2.0 * d * s + hw_f * d * d, axis=0) / count, 0.0)
    scale = gamma32 * jax.lax.rsqrt(var + eps)
    shift = beta32 - mean * scale
    scale_rows = jnp.tile(scale, (N,)).reshape(R, 1)
    shift_rows = jnp.tile(shift, (N,)).reshape(R, 1)
    if R_pad != R:
        scale_rows = jnp.pad(scale_rows, ((0, R_pad - R), (0, 0)))
        shift_rows = jnp.pad(shift_rows, ((0, R_pad - R), (0, 0)))

    # ---- pass 2: normalize; scale/shift stay VMEM-resident across the grid --
    out_rows = pl.pallas_call(
        functools.partial(_bn_norm_kernel, tr=tr2),
        out_shape=jax.ShapeDtypeStruct((R_pad, HW), dtype),
        grid=(R_pad // tr2,),
        in_specs=[pl.BlockSpec((tr2, HW), lambda i: (i, 0)),
                  pl.BlockSpec((R_pad, 1), lambda i: (0, 0)),
                  pl.BlockSpec((R_pad, 1), lambda i: (0, 0))],
        out_specs=pl.BlockSpec((tr2, HW), lambda i: (i, 0)),
        input_output_aliases=io_alias,
        compiler_params=pltpu.CompilerParams(
            dimension_semantics=("parallel",),
            vmem_limit_bytes=vmem_budget),
        cost_estimate=pl.CostEstimate(
            flops=2 * R_pad * HW, transcendentals=0,
            bytes_accessed=2 * R_pad * HW * itemsize + 2 * R_pad * 4),
    )(x_rows, scale_rows, shift_rows)

    out_2d = out_rows[:R] if R_pad != R else out_rows
    return out_2d.reshape(N, C, H, W)


# ------------------------------ module port --------------------------------- #

class SwithableBatchNormPallas:
    """JAX/Pallas port of SwithableBatchNorm.

    Holds len(bits_list)^2 independent (gamma, beta) BatchNorm2d parameter sets
    (mirroring the deep-copied BatchNorm2d modules) and applies the one
    selected by `switch_bn(bit_width)`.
    """

    def __init__(self, num_features, bits_list=None, eps=1e-5, key=None):
        self.num_features = num_features
        self.bits_list = bits_list
        self.bit_width = -1
        self._is_sample_min = False
        self.eps = eps
        if key is None:
            key = jax.random.PRNGKey(0)

        def make_params(k):
            kg, kb = jax.random.split(k)
            # Deterministic, non-trivial init (PyTorch default would be ones/zeros).
            gamma = 1.0 + 0.1 * jax.random.normal(kg, (num_features,), jnp.float32)
            beta = 0.1 * jax.random.normal(kb, (num_features,), jnp.float32)
            return gamma, beta

        if bits_list is not None:
            n = len(bits_list)
            keys = jax.random.split(key, n * n)
            self.bn_list = [[make_params(keys[i * n + j]) for j in range(n)]
                            for i in range(n)]
            self.size = n * n
        else:
            self.bn = make_params(key)
            self.size = 1

    @property
    def is_sample_min(self):
        return self._is_sample_min

    def switch_bn(self, bit_width, is_sample_min=False):
        if self.bits_list is not None:
            self.bit_width = bit_width
            self._is_sample_min = is_sample_min

    def forward(self, x):
        if self.bits_list is not None:
            if not isinstance(self.bit_width, (list, tuple)):
                i = j = 0
            else:
                w_bits, a_bits = self.bit_width
                i = self.bits_list.index(w_bits)
                j = self.bits_list.index(a_bits)
            gamma, beta = self.bn_list[i][j]
            return batchnorm2d_pallas(x, gamma, beta, self.eps)
        gamma, beta = self.bn
        return batchnorm2d_pallas(x, gamma, beta, self.eps)

    __call__ = forward


# ------------------------------ demo / check -------------------------------- #

if __name__ == "__main__":
    key = jax.random.PRNGKey(0)
    kx, kp, kx2, kx3 = jax.random.split(key, 4)
    eps = 1e-5

    def ref_bn(x, gamma, beta):
        c = x.shape[1]
        mean = jnp.mean(x, axis=(0, 2, 3), keepdims=True)
        var = jnp.mean((x - mean) ** 2, axis=(0, 2, 3), keepdims=True)
        return ((x - mean) * jax.lax.rsqrt(var + eps)
                * gamma.reshape(1, c, 1, 1) + beta.reshape(1, c, 1, 1))

    # ---- module-level check (fused fast path), matching PyTorch usage ----
    N, C, H, W = 2, 4, 16, 16
    x = jax.random.normal(kx, (N, C, H, W), jnp.float32) * 2.0 + 3.0
    bits_list = [2, 4, 8]
    mod = SwithableBatchNormPallas(num_features=C, bits_list=bits_list, key=kp)
    mod.switch_bn((4, 8))   # selects bn_list[1][2]
    out = mod(x)
    jax.block_until_ready(out)
    gamma, beta = mod.bn_list[1][2]
    assert jnp.max(jnp.abs(out - ref_bn(x, gamma, beta))) < 1e-4, "fused path mismatch"

    # ---- tiled path, multi-step grid ----
    N2, C2 = 4, 32
    x2 = jax.random.normal(kx2, (N2, C2, H, W), jnp.float32) * 1.5 - 2.0
    g2 = 1.0 + 0.05 * jnp.arange(C2, dtype=jnp.float32)
    b2 = 0.01 * jnp.arange(C2, dtype=jnp.float32)
    out2 = batchnorm2d_pallas(x2, g2, b2, eps, force_tiled=True)
    jax.block_until_ready(out2)
    assert jnp.max(jnp.abs(out2 - ref_bn(x2, g2, b2))) < 1e-4, "tiled path mismatch"

    # ---- tiled path with row padding (N*C not a multiple of 8) + mean shift ----
    N3, C3 = 2, 5
    x3 = jax.random.normal(kx3, (N3, C3, H, W), jnp.float32) + 10.0
    g3 = jnp.linspace(0.5, 1.5, C3, dtype=jnp.float32)
    b3 = jnp.linspace(-0.2, 0.2, C3, dtype=jnp.float32)
    out3 = batchnorm2d_pallas(x3, g3, b3, eps, force_tiled=True)
    jax.block_until_ready(out3)
    assert jnp.max(jnp.abs(out3 - ref_bn(x3, g3, b3))) < 1e-4, "padded tiled path mismatch"

    print("KERNEL_OK")
</pallas_src>

<mosaic_0001>
module attributes {stable_mosaic.version = 11 : i64} {
  func.func @_bn_fused_kernel(%arg0: memref<2x4x256xf32, #tpu.memory_space<vmem>>, %arg1: memref<1x4x1xf32, #tpu.memory_space<vmem>>, %arg2: memref<1x4x1xf32, #tpu.memory_space<vmem>>, %arg3: memref<2x4x256xf32, #tpu.memory_space<vmem>>) attributes {dimension_semantics = [], scalar_prefetch = 0 : i64, scratch_operands = 0 : i64, tpu.core_type = #tpu.core_type<tc>} {
    %c0 = arith.constant 0 : index
    %c0_0 = arith.constant 0 : index
    %c0_1 = arith.constant 0 : index
    %0 = vector.load %arg0[%c0, %c0_0, %c0_1] : memref<2x4x256xf32, #tpu.memory_space<vmem>>, vector<2x4x256xf32>
    %cst = arith.constant dense<0.000000e+00> : vector<2x4xf32>
    %1 = vector.multi_reduction <add>, %0, %cst [2] : vector<2x4x256xf32> to vector<2x4xf32>
    %2 = vector.shape_cast %1 : vector<2x4xf32> to vector<2x4x1xf32>
    %cst_2 = arith.constant dense<0.000000e+00> : vector<4x1xf32>
    %3 = vector.multi_reduction <add>, %2, %cst_2 [0] : vector<2x4x1xf32> to vector<4x1xf32>
    %4 = vector.shape_cast %3 : vector<4x1xf32> to vector<1x4x1xf32>
    %cst_3 = arith.constant 0.001953125 : f32
    %5 = vector.broadcast %cst_3 : f32 to vector<1x4x1xf32>
    %6 = arith.mulf %4, %5 : vector<1x4x1xf32>
    %7 = vector.broadcast %6 : vector<1x4x1xf32> to vector<2x4x256xf32>
    %8 = arith.subf %0, %7 : vector<2x4x256xf32>
    %9 = arith.mulf %8, %8 : vector<2x4x256xf32>
    %cst_4 = arith.constant dense<0.000000e+00> : vector<2x4xf32>
    %10 = vector.multi_reduction <add>, %9, %cst_4 [2] : vector<2x4x256xf32> to vector<2x4xf32>
    %11 = vector.shape_cast %10 : vector<2x4xf32> to vector<2x4x1xf32>
    %cst_5 = arith.constant dense<0.000000e+00> : vector<4x1xf32>
    %12 = vector.multi_reduction <add>, %11, %cst_5 [0] : vector<2x4x1xf32> to vector<4x1xf32>
    %13 = vector.shape_cast %12 : vector<4x1xf32> to vector<1x4x1xf32>
    %cst_6 = arith.constant 0.001953125 : f32
    %14 = vector.broadcast %cst_6 : f32 to vector<1x4x1xf32>
    %15 = arith.mulf %13, %14 : vector<1x4x1xf32>
    %c0_7 = arith.constant 0 : index
    %c0_8 = arith.constant 0 : index
    %c0_9 = arith.constant 0 : index
    %16 = vector.load %arg1[%c0_7, %c0_8, %c0_9] : memref<1x4x1xf32, #tpu.memory_space<vmem>>, vector<1x4x1xf32>
    %cst_10 = arith.constant 9.99999974E-6 : f32
    %17 = vector.broadcast %cst_10 : f32 to vector<1x4x1xf32>
    %18 = arith.addf %15, %17 : vector<1x4x1xf32>
    %19 = math.rsqrt %18 : vector<1x4x1xf32>
    %20 = arith.mulf %16, %19 : vector<1x4x1xf32>
    %c0_11 = arith.constant 0 : index
    %c0_12 = arith.constant 0 : index
    %c0_13 = arith.constant 0 : index
    %21 = vector.load %arg2[%c0_11, %c0_12, %c0_13] : memref<1x4x1xf32, #tpu.memory_space<vmem>>, vector<1x4x1xf32>
    %22 = arith.mulf %6, %20 : vector<1x4x1xf32>
    %23 = arith.subf %21, %22 : vector<1x4x1xf32>
    %24 = vector.broadcast %20 : vector<1x4x1xf32> to vector<2x4x256xf32>
    %25 = arith.mulf %0, %24 : vector<2x4x256xf32>
    %26 = vector.broadcast %23 : vector<1x4x1xf32> to vector<2x4x256xf32>
    %27 = arith.addf %25, %26 : vector<2x4x256xf32>
    %c0_14 = arith.constant 0 : index
    %c0_15 = arith.constant 0 : index
    %c0_16 = arith.constant 0 : index
    %28 = vector.load %arg3[%c0_14, %c0_15, %c0_16] : memref<2x4x256xf32, #tpu.memory_space<vmem>>, vector<2x4x256xf32>
    tpu.vector_store %arg3[%c0_14, %c0_15, %c0_16], %27 {strides = array<i32>} : memref<2x4x256xf32, #tpu.memory_space<vmem>>, vector<2x4x256xf32>,
    return
  }
}

</mosaic_0001>

<bundles_post_ra>
// kernel: tpu_custom_call.1
= control target key start
LH: loop header
LB: loop body
LE: loop exit
PB: predicated region body
PF: predicated region fallthrough
CT: control target
= control target key end

     0   :  { %8 = vsyncpa [#allocation3], 0  ;;  %s287_s0 = inlined_call_operand.hbm [shape: f32[2,4,256], index: 0, kind: input, shape index: {}]   ;;  %s288_s1 = inlined_call_operand.vmem [shape: f32[1,4,1], index: 1, kind: input, shape index: {}]   ;;  %s289_s2 = inlined_call_operand.vmem [shape: f32[1,4,1], index: 2, kind: input, shape index: {}]   ;;  %s290_s3 = inlined_call_operand.hbm [shape: f32[2,4,256], index: 3, kind: output, shape index: {}]  }
   0x1   :  { %9 = vsyncpa [#allocation4], 0  ;;  %s199_s12 = smov [#allocation2]   ;;  %s151_s16 = scalar_lea.hbm %s287_s0, 256 }
   0x2   :  { %s15_s13 = sshll.u32 %s199_s12, 4  ;;  %p152_p0 = scmp.ne.s32.totalorder %s287_s0, %s151_s16  ;;  %s16_s13 = int_to_ptr.vmem [resolvable:$true] %s15_s13 }
   0x3   :  { %p155_p1 = scmp.lt.u32.totalorder %s151_s16, %s287_s0 }
   0x5   :  { %p157_p2 = pnand %p155_p1, %p152_p0 }
   0x7   :  { %160 = shalt.err (!%p157_p2)
}
   0x8   :  { %s161_s21 = scalar_lea.vmem %s16_s13, 256  ;;  %p166_p4 = scmp.lt.s32.totalorder %s16_s13, %s16_s13 }
   0x9   :  { %p162_p3 = scmp.ne.s32.totalorder %s16_s13, %s161_s21  ;;  %p167_p5 = scmp.lt.s32.totalorder %s161_s21, %s161_s21 }
   0xb   :  { %p168_p6 = por %p167_p5, %p166_p4 }
   0xd   :  { %p169_p7 = pnand %p168_p6, %p162_p3 }
   0xf   :  { %172 = shalt.err (!%p169_p7)
}
  0x10   :  { %s200_s22 = smov 128   ;;  %s201_s23 = smov 8  }
  0x11   :  { %21 = dma.hbm_to_vmem [thread:$0]  %s287_s0, 256, %s16_s13, [#allocation3], %s200_s22, %s200_s22, %s201_s23  }
  0x12   :  { %195 = dma.done.wait [#allocation3], 256  }
  0x13   :  { %196 = vsyncadd [#allocation3], 4294967040  ;;  %vm37_vm0 = vcmask 1043456   ;;  %v240_v0 = vld [vmem:[#allocation2] sm:$0xff]  ;;  %v242_v1 = vld [vmem:[#allocation2 + $0x8] sm:$0xff]  ;;  %v56_v12 = vlaneseq  ;;  %v203_v35 = vmov 0  }
  0x14   :  { %v33_v2 = vcombine.high %v240_v0, %v240_v0  ;;  %v38_v3 = vsel %vm37_vm0, %v240_v0, 0.0  ;;  %v34_v4 = vcombine.high %v242_v1, %v242_v1  ;;  %v43_v6 = vsel %vm37_vm0, %v242_v1, 0.0  ;;  %145 = vset.pattern.permute.xlu0 %v203_v35  ;;  %146 = vset.pattern.permute.xlu1 %v203_v35  ;;  %v85_v43 = vld [vmem:[%s288_s1] sm:$0xf]  ;;  %s204_s29 = smov [#allocation5]  }
  0x15   :  { %v202_v10 = vmov 839922192   ;;  %v57_v15 = vshrl.u32 %v56_v12, 7  ;;  %v89_v46 = vld [vmem:[%s289_s2] sm:$0xf]  ;;  %s127_s30 = sshll.u32 %s204_s29, 4  ;;  %s128_s30 = int_to_ptr.vmem [resolvable:$true] %s127_s30 }
  0x16   :  { %v39_v5 = vsel %vm37_vm0, %v33_v2, 0.0  ;;  %v44_v7 = vsel %vm37_vm0, %v34_v4, 0.0  ;;  %v54_v11 = vunpack.c.l.s4 %v202_v10  ;;  %s173_s1 = scalar_lea.vmem %s128_s30, 256  ;;  %p178_p9 = scmp.lt.s32.totalorder %s128_s30, %s128_s30 }
  0x17   :  { %v40_v8 = vadd.f32 %v39_v5, %v38_v3  ;;  %v45_v9 = vadd.f32 %v44_v7, %v43_v6  ;;  %p174_p8 = scmp.ne.s32.totalorder %s128_s30, %s173_s1  ;;  %p179_p10 = scmp.lt.s32.totalorder %s173_s1, %s173_s1 }
  0x18   :  { %v55_v14 = vunpack.c.0.s8 %v54_v11 }
  0x19   :  { %41 = vadd.xlane.f32.xlu0 %v40_v8  ;;  %p180_p11 = por %p179_p10, %p178_p9 }
  0x1a   :  { %v58_v19 = vsub.s32 %v55_v14, %v57_v15 }
  0x1b   :  { %p181_p12 = pnand %p180_p11, %p174_p8 }
  0x1d   :  { %46 = vadd.xlane.f32.xlu0 %v45_v9 }
  0xa6   :  { %v42_v13 = vpop.xlane.xlu0 %41 }
  0xa7   :  { %v48_v17 = vsel %vm37_vm0, %v42_v13, 0.0 }
  0xaa   :  { %v47_v16 = vpop.xlane.xlu0 %46 }
  0xab   :  { %v49_v18 = vsel %vm37_vm0, %v47_v16, 0.0 }
  0xac   :  { %v50_v20 = vadd.f32 %v49_v18, %v48_v17 }
  0xae   :  { %v51_v21 = vmul.f32 0.001953125, %v50_v20 }
  0xb0   :  { %v59_v22 = vrot.slane %v51_v21, %v58_v19 }
  0xb2   :  { %v61_v23 = vsub.f32 %v240_v0, %v59_v22  ;;  %v62_v24 = vsub.f32 %v242_v1, %v59_v22 }
  0xb4   :  { %v63_v25 = vmul.f32 %v61_v23, %v61_v23  ;;  %v64_v26 = vmul.f32 %v62_v24, %v62_v24 }
  0xb6   :  { %v67_v27 = vcombine.high %v63_v25, %v63_v25  ;;  %v68_v28 = vcombine.high %v64_v26, %v64_v26  ;;  %v71_v29 = vsel %vm37_vm0, %v63_v25, 0.0  ;;  %v76_v33 = vsel %vm37_vm0, %v64_v26, 0.0 }
  0xb8   :  { %v72_v30 = vsel %vm37_vm0, %v67_v27, 0.0  ;;  %v77_v32 = vsel %vm37_vm0, %v68_v28, 0.0 }
  0xb9   :  { %v73_v31 = vadd.f32 %v72_v30, %v71_v29  ;;  %v78_v34 = vadd.f32 %v77_v32, %v76_v33 }
  0xbb   :  { %74 = vadd.xlane.f32.xlu1 %v73_v31 }
  0xbf   :  { %79 = vadd.xlane.f32.xlu1 %v78_v34 }
 0x148   :  { %v75_v36 = vpop.xlane.xlu1 %74 }
 0x149   :  { %v81_v38 = vsel %vm37_vm0, %v75_v36, 0.0 }
 0x14c   :  { %v80_v37 = vpop.xlane.xlu1 %79 }
 0x14d   :  { %v82_v39 = vsel %vm37_vm0, %v80_v37, 0.0 }
 0x14e   :  { %v83_v40 = vadd.f32 %v82_v39, %v81_v38 }
 0x150   :  { %v84_v41 = vmul.f32 0.001953125, %v83_v40 }
 0x152   :  { %v86_v42 = vadd.f32 1e-05, %v84_v41 }
 0x154   :  { %149 = vrsqrt.f32 %v86_v42 }
 0x15e   :  { %v150_v44 = vpop.eup %149 }
 0x15f   :  { %v88_v45 = vmul.f32 %v150_v44, %v85_v43 }
 0x161   :  { %94 = vperm.xlu0 %145, %v88_v45   ;;  %v90_v47 = vmul.f32 %v88_v45, %v51_v21 }
 0x163   :  { %v91_v48 = vsub.f32 %v89_v46, %v90_v47 }
 0x165   :  { %108 = vperm.xlu1 %146, %v91_v48  }
 0x1e0   :  { %v95_v49 = vpop.permute.xlu0 %94 }
 0x1e1   :  { %v102_v50 = vrot.slane %v95_v49, %v58_v19 }
 0x1e3   :  { %v104_v52 = vmul.f32 %v102_v50, %v240_v0  ;;  %v105_v53 = vmul.f32 %v102_v50, %v242_v1 }
 0x1e4   :  { %v109_v51 = vpop.permute.xlu1 %108 }
 0x1e5   :  { %v116_v54 = vrot.slane %v109_v51, %v58_v19 }
 0x1e7   :  { %v118_v55 = vadd.f32 %v116_v54, %v104_v52  ;;  %v119_v56 = vadd.f32 %v116_v54, %v105_v53 }
 0x1e9   :  { %120 = vst [vmem:[#allocation5] sm:$0xff] %v118_v55  ;;  %121 = vst [vmem:[#allocation5 + $0x8] sm:$0xff] %v119_v56 }
 0x1ea   :  { %184 = shalt.err (!%p181_p12)
}
 0x1eb   :  { %s185_s5 = scalar_lea.hbm %s290_s3, 256 }
 0x1ec   :  { %p186_p13 = scmp.ne.s32.totalorder %s290_s3, %s185_s5  ;;  %p189_p0 = scmp.lt.u32.totalorder %s185_s5, %s290_s3 }
 0x1ee   :  { %p191_p1 = pnand %p189_p0, %p186_p13 }
 0x1f0   :  { %194 = shalt.err (!%p191_p1)
}
 0x1f1   :  { %133 = dma.vmem_to_hbm [thread:$0]  %s128_s30, 256, %s290_s3, [#allocation4], %s200_s22, %s200_s22, %s201_s23  }
 0x1f2   :  { %197 = dma.done.wait [#allocation4], 256  }
 0x1f3   :  { %198 = vsyncadd [#allocation4], 4294967040 }
 0x1f4   :  { %137 = vsyncpa [#allocation3], 1 }
 0x1f5   :  { %138 = vsyncpa [#allocation4], 1 }

</bundles_post_ra>
